<compile_context>
chip_gen: v7x
topology: tpu7x:2x2x1
jax: 0.10.0
libtpu: 0.0.40
codegen_flags: <defaults>
</compile_context>

<pallas_src>
import jax
import jax.numpy as jnp
from jax.experimental import pallas as pl
from jax.experimental.pallas import tpu as pltpu

# ----------------------------- model config ---------------------------------
NODE_TYPES   = ["author", "paper", "term", "conference"]
NODE_COUNTS  = [8, 12, 8, 4]              # author first -> x[:num_nodes] = authors
INIT_SIZES   = [16, 24, 8, 8]             # per-type raw feature dims
EDGE_TYPES   = [("author", "paper"), ("paper", "author"),
                ("paper", "term"),   ("term", "paper"),
                ("paper", "conference"), ("conference", "paper")]
NUM_RELATIONS = len(EDGE_TYPES)           # 6
NUM_BASES     = 30
IN_CHANNELS   = 16
HIDDEN_CHANNELS = 32
OUT_CHANNELS  = 4
NUM_AUTHOR_NODES = NODE_COUNTS[0]
EDGES_PER_REL = 20
RAW_TOTAL     = sum(INIT_SIZES)           # 56
NUM_NODES_TOTAL = sum(NODE_COUNTS)        # 32

# relation 0 = identity/root, relations 1..R = the 6 edge types
R1 = NUM_RELATIONS + 1                    # 7

# ---- packed-slab layout (compile-time constants) ----------------------------
SLAB_W    = R1 * NUM_NODES_TOTAL          # 224 lanes (also = R1*HIDDEN)
ROW_XRAW  = 0
ROW_WLIN  = ROW_XRAW + NUM_NODES_TOTAL    # 32
ROW_ACAT  = ROW_WLIN + RAW_TOTAL          # 88
ROW_WST1  = ROW_ACAT + NUM_NODES_TOTAL    # 120
ROW_WST2  = ROW_WST1 + IN_CHANNELS        # 136
SLAB_ROWS = ROW_WST2 + HIDDEN_CHANNELS    # 168   (all offsets 8-aligned)

COL_BLIN  = 0
COL_B1    = COL_BLIN + IN_CHANNELS        # 16
COL_B2    = COL_B1 + HIDDEN_CHANNELS      # 48
BSLAB_W   = COL_B2 + OUT_CHANNELS         # 52


# ----------------------------- fused Pallas kernel ---------------------------

def _rgcn_fused_kernel(wslab_ref, bslab_ref, out_ref):
    # single load of each slab; everything below is static value slicing
    w = wslab_ref[...]                                            # (168, 224) bf16
    b = bslab_ref[...]                                            # (32, 52)  f32

    xraw  = w[ROW_XRAW:ROW_XRAW + NUM_NODES_TOTAL, :RAW_TOTAL]    # (32, 56)
    wlin  = w[ROW_WLIN:ROW_WLIN + RAW_TOTAL, :IN_CHANNELS]        # (56, 16)
    a_cat = w[ROW_ACAT:ROW_ACAT + NUM_NODES_TOTAL, :]             # (32, 224)
    wst1  = w[ROW_WST1:ROW_WST1 + IN_CHANNELS, :R1 * HIDDEN_CHANNELS]   # (16, 224)
    wst2  = w[ROW_WST2:ROW_WST2 + HIDDEN_CHANNELS, :R1 * OUT_CHANNELS]  # (32, 28)

    blin = b[:, COL_BLIN:COL_BLIN + IN_CHANNELS]                  # (32, 16) f32
    b1   = b[:, COL_B1:COL_B1 + HIDDEN_CHANNELS]                  # (32, 32) f32
    b2   = b[:, COL_B2:COL_B2 + OUT_CHANNELS]                     # (32, 4)  f32

    # ---- per-type input linears as one block-diagonal matmul (bf16 -> f32 acc)
    x0 = jnp.dot(xraw, wlin, preferred_element_type=jnp.float32) + blin   # (N, Cin)

    # ---- one folded RGCNConv: 2 MXU contractions total ----------------------
    def rgcn_conv(x_f32, w_stack, bias, cout):
        xb = x_f32.astype(jnp.bfloat16)
        # all (R+1) relation transforms (root first) in ONE matmul
        y = jnp.dot(xb, w_stack, preferred_element_type=jnp.float32)     # (N, R1*cout)
        # rearrange to the ((R+1)*N, cout) vertical stack via static lane
        # slices + one sublane concat (no generic reshape/transpose)
        yv = jnp.concatenate(
            [y[:, r * cout:(r + 1) * cout] for r in range(R1)], axis=0)  # (R1*N, cout)
        # aggregation over self-loop + all relations in ONE matmul, K = 224
        return jnp.dot(a_cat, yv.astype(jnp.bfloat16),
                       preferred_element_type=jnp.float32) + bias

    h = rgcn_conv(x0, wst1, b1, HIDDEN_CHANNELS)   # (N, hidden) f32
    y = rgcn_conv(h,  wst2, b2, OUT_CHANNELS)      # (N, out)    f32

    # ---- author slice + row softmax (exact divide; keeps row sums tight) ----
    ya = y[:NUM_AUTHOR_NODES]
    m = jnp.max(ya, axis=1, keepdims=True)
    e = jnp.exp(ya - m)
    out_ref[...] = e / jnp.sum(e, axis=1, keepdims=True)


# ----------------------------- glue (plain JAX prep) --------------------------

def build_adj(edge_index, edge_type, num_relations, num_nodes):
    """Dense per-relation adjacency with mean normalization per target node
    (matches PyG RGCNConv default aggr='mean')."""
    src, dst = edge_index[0], edge_index[1]
    adj = jnp.zeros((num_relations, num_nodes, num_nodes), jnp.float32)
    adj = adj.at[edge_type, dst, src].add(1.0)
    deg = adj.sum(axis=-1, keepdims=True)
    return adj / jnp.maximum(deg, 1.0)


def init_params(key):
    keys = jax.random.split(key, len(INIT_SIZES) + 2)
    lins = []
    for i, s in enumerate(INIT_SIZES):
        kw, kb = jax.random.split(keys[i])
        # stored as (in, out) == nn.Linear.weight.T
        w = jax.random.normal(kw, (s, IN_CHANNELS), jnp.float32) / jnp.sqrt(float(s))
        b = jax.random.normal(kb, (IN_CHANNELS,), jnp.float32) * 0.01
        lins.append((w, b))

    def rgcn_conv_params(k, fin, fout):
        k1, k2, k3, k4 = jax.random.split(k, 4)
        return dict(
            comp=jax.random.normal(k1, (NUM_RELATIONS, NUM_BASES), jnp.float32) * 0.1,
            bases=jax.random.normal(k2, (NUM_BASES, fin, fout), jnp.float32) / jnp.sqrt(float(fin)),
            root=jax.random.normal(k3, (fin, fout), jnp.float32) / jnp.sqrt(float(fin)),
            bias=jax.random.normal(k4, (fout,), jnp.float32) * 0.01,
        )

    return dict(
        lins=lins,
        conv1=rgcn_conv_params(keys[-2], IN_CHANNELS, HIDDEN_CHANNELS),
        conv2=rgcn_conv_params(keys[-1], HIDDEN_CHANNELS, OUT_CHANNELS),
    )


def make_graph(key):
    counts = dict(zip(NODE_TYPES, NODE_COUNTS))
    offsets, off = {}, 0
    for t, c in zip(NODE_TYPES, NODE_COUNTS):
        offsets[t] = off
        off += c
    N = off
    keys = jax.random.split(key, len(NODE_TYPES) + NUM_RELATIONS)
    feats = {t: jax.random.normal(keys[i], (c, s), jnp.float32)
             for i, (t, c, s) in enumerate(zip(NODE_TYPES, NODE_COUNTS, INIT_SIZES))}
    srcs, dsts, etys = [], [], []
    for r, (st, dt) in enumerate(EDGE_TYPES):
        ks, kd = jax.random.split(keys[len(NODE_TYPES) + r])
        s_local = jax.random.randint(ks, (EDGES_PER_REL,), 0, counts[st])
        d_local = jax.random.randint(kd, (EDGES_PER_REL,), 0, counts[dt])
        srcs.append(s_local + offsets[st])
        dsts.append(d_local + offsets[dt])
        etys.append(jnp.full((EDGES_PER_REL,), r, jnp.int32))
    edge_index = jnp.stack([jnp.concatenate(srcs), jnp.concatenate(dsts)])
    edge_type = jnp.concatenate(etys)
    return feats, edge_index, edge_type, N


def _place(slab, a, row, col=0):
    return slab.at[row:row + a.shape[0], col:col + a.shape[1]].set(a)


def rgcn_forward(params, feats, edge_index, edge_type, num_total_nodes):
    N, S = num_total_nodes, RAW_TOTAL

    # --- pack per-type features / linears into one block-diagonal problem ----
    xraw = jnp.zeros((N, S), jnp.float32)            # block-diagonal raw features
    wlin = jnp.zeros((S, IN_CHANNELS), jnp.float32)  # stacked nn.Linear weight.T
    blin = jnp.zeros((N, IN_CHANNELS), jnp.float32)  # per-node bias (by node type)
    n_off = f_off = 0
    for t, cnt, sz, (w, b) in zip(NODE_TYPES, NODE_COUNTS, INIT_SIZES, params["lins"]):
        xraw = xraw.at[n_off:n_off + cnt, f_off:f_off + sz].set(feats[t])
        wlin = wlin.at[f_off:f_off + sz, :].set(w)
        blin = blin.at[n_off:n_off + cnt, :].set(jnp.broadcast_to(b, (cnt, IN_CHANNELS)))
        n_off += cnt
        f_off += sz

    # --- adjacency: prepend identity (root/self-loop) and pre-concat ---------
    adj = build_adj(edge_index, edge_type, NUM_RELATIONS, N)             # (R, N, N)
    adj_aug = jnp.concatenate([jnp.eye(N, dtype=jnp.float32)[None], adj], axis=0)
    a_cat = jnp.transpose(adj_aug, (1, 0, 2)).reshape(N, R1 * N)         # (N, 224)

    # --- basis decomposition + root stacked as [root | W_1 | ... | W_R] ------
    def stack_weights(conv, fin, fout):
        w_r = jnp.einsum("rb,bio->rio", conv["comp"], conv["bases"])     # (R, fin, fout)
        w_aug = jnp.concatenate([conv["root"][None], w_r], axis=0)       # (R+1, fin, fout)
        return jnp.transpose(w_aug, (1, 0, 2)).reshape(fin, R1 * fout)

    wst1 = stack_weights(params["conv1"], IN_CHANNELS, HIDDEN_CHANNELS)  # (16, 224)
    wst2 = stack_weights(params["conv2"], HIDDEN_CHANNELS, OUT_CHANNELS) # (32, 28)

    # --- pack everything into 2 slabs: one bf16 (MXU operands), one f32 ------
    wslab = jnp.zeros((SLAB_ROWS, SLAB_W), jnp.float32)
    wslab = _place(wslab, xraw, ROW_XRAW)
    wslab = _place(wslab, wlin, ROW_WLIN)
    wslab = _place(wslab, a_cat, ROW_ACAT)
    wslab = _place(wslab, wst1, ROW_WST1)
    wslab = _place(wslab, wst2, ROW_WST2)
    wslab = wslab.astype(jnp.bfloat16)

    bslab = jnp.zeros((N, BSLAB_W), jnp.float32)
    bslab = _place(bslab, blin, 0, COL_BLIN)
    bslab = _place(bslab, jnp.broadcast_to(params["conv1"]["bias"],
                                           (N, HIDDEN_CHANNELS)), 0, COL_B1)
    bslab = _place(bslab, jnp.broadcast_to(params["conv2"]["bias"],
                                           (N, OUT_CHANNELS)), 0, COL_B2)

    def full(shape):
        return pl.BlockSpec(tuple(shape), lambda i, _s=len(shape): (0,) * _s)

    # advisory cost estimate for XLA's scheduler
    flops = 2 * N * S * IN_CHANNELS
    flops += 2 * N * IN_CHANNELS * (R1 * HIDDEN_CHANNELS) + 2 * N * (R1 * N) * HIDDEN_CHANNELS
    flops += 2 * N * HIDDEN_CHANNELS * (R1 * OUT_CHANNELS) + 2 * N * (R1 * N) * OUT_CHANNELS
    bytes_accessed = (int(wslab.size) * 2 + int(bslab.size) * 4
                      + NUM_AUTHOR_NODES * OUT_CHANNELS * 4)

    return pl.pallas_call(
        _rgcn_fused_kernel,
        out_shape=jax.ShapeDtypeStruct((NUM_AUTHOR_NODES, OUT_CHANNELS), jnp.float32),
        grid=(1,),
        in_specs=[full(wslab.shape), full(bslab.shape)],
        out_specs=full((NUM_AUTHOR_NODES, OUT_CHANNELS)),
        compiler_params=pltpu.CompilerParams(dimension_semantics=("arbitrary",)),
        cost_estimate=pl.CostEstimate(flops=int(flops),
                                      transcendentals=NUM_AUTHOR_NODES * OUT_CHANNELS,
                                      bytes_accessed=int(bytes_accessed)),
    )(wslab, bslab)


# ----------------------------- main ------------------------------------------
if __name__ == "__main__":
    key = jax.random.PRNGKey(0)
    k_graph, k_params = jax.random.split(key)
    feats, edge_index, edge_type, N = make_graph(k_graph)
    params = init_params(k_params)

    out = rgcn_forward(params, feats, edge_index, edge_type, N)
    out = jax.block_until_ready(out)

    assert out.shape == (NUM_AUTHOR_NODES, OUT_CHANNELS)
    # rows of a softmax must sum to 1
    assert bool(jnp.allclose(out.sum(axis=1), 1.0, atol=1e-4))
    print("KERNEL_OK")
</pallas_src>

<mosaic_0001>
module attributes {stable_mosaic.version = 11 : i64} {
  func.func @_rgcn_fused_kernel(%arg0: i32, %arg1: memref<168x224xbf16, #tpu.memory_space<vmem>>, %arg2: memref<32x52xf32, #tpu.memory_space<vmem>>, %arg3: memref<8x4xf32, #tpu.memory_space<vmem>>) attributes {dimension_semantics = [#tpu.dimension_semantics<arbitrary>], iteration_bounds = array<i64: 1>, scalar_prefetch = 0 : i64, scratch_operands = 0 : i64, tpu.core_type = #tpu.core_type<tc>, window_params = [{pipeline_mode = #tpu.pipeline_mode<synchronous>, transform_indices = @transform_0, window_bounds = array<i64: 168, 224>}, {pipeline_mode = #tpu.pipeline_mode<synchronous>, transform_indices = @transform_1, window_bounds = array<i64: 32, 52>}, {pipeline_mode = #tpu.pipeline_mode<synchronous>, transform_indices = @transform_2, window_bounds = array<i64: 8, 4>}]} {
    %c0 = arith.constant 0 : index
    %c0_0 = arith.constant 0 : index
    %0 = vector.load %arg1[%c0, %c0_0] : memref<168x224xbf16, #tpu.memory_space<vmem>>, vector<168x224xbf16>
    %c0_1 = arith.constant 0 : index
    %c0_2 = arith.constant 0 : index
    %1 = vector.load %arg2[%c0_1, %c0_2] : memref<32x52xf32, #tpu.memory_space<vmem>>, vector<32x52xf32>
    %2 = vector.extract_strided_slice %0 {offsets = [0, 0], sizes = [32, 56], strides = [1, 1]} : vector<168x224xbf16> to vector<32x56xbf16>
    %3 = vector.extract_strided_slice %0 {offsets = [32, 0], sizes = [56, 16], strides = [1, 1]} : vector<168x224xbf16> to vector<56x16xbf16>
    %4 = vector.extract_strided_slice %0 {offsets = [88, 0], sizes = [32, 224], strides = [1, 1]} : vector<168x224xbf16> to vector<32x224xbf16>
    %5 = vector.extract_strided_slice %0 {offsets = [120, 0], sizes = [16, 224], strides = [1, 1]} : vector<168x224xbf16> to vector<16x224xbf16>
    %6 = vector.extract_strided_slice %0 {offsets = [136, 0], sizes = [32, 28], strides = [1, 1]} : vector<168x224xbf16> to vector<32x28xbf16>
    %7 = vector.extract_strided_slice %1 {offsets = [0, 0], sizes = [32, 16], strides = [1, 1]} : vector<32x52xf32> to vector<32x16xf32>
    %8 = vector.extract_strided_slice %1 {offsets = [0, 16], sizes = [32, 32], strides = [1, 1]} : vector<32x52xf32> to vector<32x32xf32>
    %9 = vector.extract_strided_slice %1 {offsets = [0, 48], sizes = [32, 4], strides = [1, 1]} : vector<32x52xf32> to vector<32x4xf32>
    %cst = arith.constant dense<0.000000e+00> : vector<32x16xf32>
    %10 = tpu.matmul %2, %3, %cst {dimension_numbers = #tpu.dot_dimension_numbers<[1], [0], [0], [1], [0, 0, 1, 1], [], []>} : vector<32x56xbf16>, vector<56x16xbf16>, vector<32x16xf32> -> vector<32x16xf32>
    %11 = arith.addf %10, %7 : vector<32x16xf32>
    %12 = arith.truncf %11 : vector<32x16xf32> to vector<32x16xbf16>
    %cst_3 = arith.constant dense<0.000000e+00> : vector<32x224xf32>
    %13 = tpu.matmul %12, %5, %cst_3 {dimension_numbers = #tpu.dot_dimension_numbers<[1], [0], [0], [1], [0, 0, 1, 1], [], []>} : vector<32x16xbf16>, vector<16x224xbf16>, vector<32x224xf32> -> vector<32x224xf32>
    %14 = vector.extract_strided_slice %13 {offsets = [0, 0], sizes = [32, 32], strides = [1, 1]} : vector<32x224xf32> to vector<32x32xf32>
    %15 = vector.extract_strided_slice %13 {offsets = [0, 32], sizes = [32, 32], strides = [1, 1]} : vector<32x224xf32> to vector<32x32xf32>
    %16 = vector.extract_strided_slice %13 {offsets = [0, 64], sizes = [32, 32], strides = [1, 1]} : vector<32x224xf32> to vector<32x32xf32>
    %17 = vector.extract_strided_slice %13 {offsets = [0, 96], sizes = [32, 32], strides = [1, 1]} : vector<32x224xf32> to vector<32x32xf32>
    %18 = vector.extract_strided_slice %13 {offsets = [0, 128], sizes = [32, 32], strides = [1, 1]} : vector<32x224xf32> to vector<32x32xf32>
    %19 = vector.extract_strided_slice %13 {offsets = [0, 160], sizes = [32, 32], strides = [1, 1]} : vector<32x224xf32> to vector<32x32xf32>
    %20 = vector.extract_strided_slice %13 {offsets = [0, 192], sizes = [32, 32], strides = [1, 1]} : vector<32x224xf32> to vector<32x32xf32>
    %21 = tpu.concatenate %14, %15, %16, %17, %18, %19, %20 in 0 : vector<32x32xf32>, vector<32x32xf32>, vector<32x32xf32>, vector<32x32xf32>, vector<32x32xf32>, vector<32x32xf32>, vector<32x32xf32> -> vector<224x32xf32>
    %22 = arith.truncf %21 : vector<224x32xf32> to vector<224x32xbf16>
    %cst_4 = arith.constant dense<0.000000e+00> : vector<32x32xf32>
    %23 = tpu.matmul %4, %22, %cst_4 {dimension_numbers = #tpu.dot_dimension_numbers<[1], [0], [0], [1], [0, 0, 1, 1], [], []>} : vector<32x224xbf16>, vector<224x32xbf16>, vector<32x32xf32> -> vector<32x32xf32>
    %24 = arith.addf %23, %8 : vector<32x32xf32>
    %25 = arith.truncf %24 : vector<32x32xf32> to vector<32x32xbf16>
    %cst_5 = arith.constant dense<0.000000e+00> : vector<32x28xf32>
    %26 = tpu.matmul %25, %6, %cst_5 {dimension_numbers = #tpu.dot_dimension_numbers<[1], [0], [0], [1], [0, 0, 1, 1], [], []>} : vector<32x32xbf16>, vector<32x28xbf16>, vector<32x28xf32> -> vector<32x28xf32>
    %27 = vector.extract_strided_slice %26 {offsets = [0, 0], sizes = [32, 4], strides = [1, 1]} : vector<32x28xf32> to vector<32x4xf32>
    %28 = vector.extract_strided_slice %26 {offsets = [0, 4], sizes = [32, 4], strides = [1, 1]} : vector<32x28xf32> to vector<32x4xf32>
    %29 = vector.extract_strided_slice %26 {offsets = [0, 8], sizes = [32, 4], strides = [1, 1]} : vector<32x28xf32> to vector<32x4xf32>
    %30 = vector.extract_strided_slice %26 {offsets = [0, 12], sizes = [32, 4], strides = [1, 1]} : vector<32x28xf32> to vector<32x4xf32>
    %31 = vector.extract_strided_slice %26 {offsets = [0, 16], sizes = [32, 4], strides = [1, 1]} : vector<32x28xf32> to vector<32x4xf32>
    %32 = vector.extract_strided_slice %26 {offsets = [0, 20], sizes = [32, 4], strides = [1, 1]} : vector<32x28xf32> to vector<32x4xf32>
    %33 = vector.extract_strided_slice %26 {offsets = [0, 24], sizes = [32, 4], strides = [1, 1]} : vector<32x28xf32> to vector<32x4xf32>
    %34 = tpu.concatenate %27, %28, %29, %30, %31, %32, %33 in 0 : vector<32x4xf32>, vector<32x4xf32>, vector<32x4xf32>, vector<32x4xf32>, vector<32x4xf32>, vector<32x4xf32>, vector<32x4xf32> -> vector<224x4xf32>
    %35 = arith.truncf %34 : vector<224x4xf32> to vector<224x4xbf16>
    %cst_6 = arith.constant dense<0.000000e+00> : vector<32x4xf32>
    %36 = tpu.matmul %4, %35, %cst_6 {dimension_numbers = #tpu.dot_dimension_numbers<[1], [0], [0], [1], [0, 0, 1, 1], [], []>} : vector<32x224xbf16>, vector<224x4xbf16>, vector<32x4xf32> -> vector<32x4xf32>
    %37 = arith.addf %36, %9 : vector<32x4xf32>
    %38 = vector.extract_strided_slice %37 {offsets = [0, 0], sizes = [8, 4], strides = [1, 1]} : vector<32x4xf32> to vector<8x4xf32>
    %cst_7 = arith.constant dense<0xFF800000> : vector<8xf32>
    %39 = vector.multi_reduction <maximumf>, %38, %cst_7 [1] : vector<8x4xf32> to vector<8xf32>
    %40 = vector.shape_cast %39 : vector<8xf32> to vector<8x1xf32>
    %41 = vector.broadcast %40 : vector<8x1xf32> to vector<8x4xf32>
    %42 = arith.subf %38, %41 : vector<8x4xf32>
    %43 = math.exp %42 : vector<8x4xf32>
    %cst_8 = arith.constant dense<0.000000e+00> : vector<8xf32>
    %44 = vector.multi_reduction <add>, %43, %cst_8 [1] : vector<8x4xf32> to vector<8xf32>
    %45 = vector.shape_cast %44 : vector<8xf32> to vector<8x1xf32>
    %46 = vector.broadcast %45 : vector<8x1xf32> to vector<8x4xf32>
    %47 = arith.divf %43, %46 : vector<8x4xf32>
    %c0_9 = arith.constant 0 : index
    %c0_10 = arith.constant 0 : index
    %48 = vector.load %arg3[%c0_9, %c0_10] : memref<8x4xf32, #tpu.memory_space<vmem>>, vector<8x4xf32>
    tpu.vector_store %arg3[%c0_9, %c0_10], %47 {strides = array<i32>} : memref<8x4xf32, #tpu.memory_space<vmem>>, vector<8x4xf32>,
    return
  }
  func.func @transform_0(%arg0: i32) -> (i32, i32) {
    %c0_i32 = arith.constant 0 : i32
    %c0_i32_0 = arith.constant 0 : i32
    %c0_i32_1 = arith.constant 0 : i32
    return %c0_i32, %c0_i32_0 : i32, i32
  }
  func.func @transform_1(%arg0: i32) -> (i32, i32) {
    %c0_i32 = arith.constant 0 : i32
    %c0_i32_0 = arith.constant 0 : i32
    %c0_i32_1 = arith.constant 0 : i32
    return %c0_i32, %c0_i32_0 : i32, i32
  }
  func.func @transform_2(%arg0: i32) -> (i32, i32) {
    %c0_i32 = arith.constant 0 : i32
    %c0_i32_0 = arith.constant 0 : i32
    %c0_i32_1 = arith.constant 0 : i32
    return %c0_i32, %c0_i32_0 : i32, i32
  }
}

</mosaic_0001>

<bundles_post_ra>
// kernel: tpu_custom_call.1
= control target key start
LH: loop header
LB: loop body
LE: loop exit
PB: predicated region body
PF: predicated region fallthrough
CT: control target
= control target key end

     0   :  { %7 = vsyncpa [#allocation3], 0  ;;  %s1013_s0 = inlined_call_operand.hbm [shape: bf16[168,224], index: 0, kind: input, shape index: {}]   ;;  %s1014_s1 = inlined_call_operand.hbm [shape: f32[32,52], index: 1, kind: input, shape index: {}]   ;;  %s1015_s2 = inlined_call_operand.vmem [shape: f32[8,4], index: 2, kind: output, shape index: {}]  }
   0x1   :  { %8 = vsyncpa [#allocation5], 0  ;;  %s877_s9 = smov [#allocation2]   ;;  %s829_s13 = scalar_lea.hbm %s1013_s0, 2688 }
   0x2   :  { %s14_s10 = sshll.u32 %s877_s9, 4  ;;  %p830_p0 = scmp.ne.s32.totalorder %s1013_s0, %s829_s13  ;;  %s15_s10 = int_to_ptr.vmem [resolvable:$true] %s14_s10 }
   0x3   :  { %p833_p1 = scmp.lt.u32.totalorder %s829_s13, %s1013_s0 }
   0x5   :  { %p835_p2 = pnand %p833_p1, %p830_p0 }
   0x7   :  { %838 = shalt.err (!%p835_p2)
}
   0x8   :  { %s839_s18 = scalar_lea.vmem %s15_s10, 2688  ;;  %p844_p4 = scmp.lt.s32.totalorder %s15_s10, %s15_s10 }
   0x9   :  { %p840_p3 = scmp.ne.s32.totalorder %s15_s10, %s839_s18  ;;  %p845_p5 = scmp.lt.s32.totalorder %s839_s18, %s839_s18 }
   0xb   :  { %p846_p6 = por %p845_p5, %p844_p4 }
   0xd   :  { %p847_p7 = pnand %p846_p6, %p840_p3 }
   0xf   :  { %850 = shalt.err (!%p847_p7)
}
  0x10   :  { %s878_s19 = smov 128   ;;  %s879_s20 = smov 8  }
  0x11   :  { %20 = dma.hbm_to_vmem [thread:$0]  %s1013_s0, 2688, %s15_s10, [#allocation3], %s878_s19, %s878_s19, %s879_s20  }
  0x12   :  { %s880_s23 = smov [#allocation4]   ;;  %s851_s27 = scalar_lea.hbm %s1014_s1, 512 }
  0x13   :  { %s26_s24 = sshll.u32 %s880_s23, 4  ;;  %p852_p8 = scmp.ne.s32.totalorder %s1014_s1, %s851_s27  ;;  %s27_s24 = int_to_ptr.vmem [resolvable:$true] %s26_s24 }
  0x14   :  { %p855_p9 = scmp.lt.u32.totalorder %s851_s27, %s1014_s1 }
  0x16   :  { %p857_p10 = pnand %p855_p9, %p852_p8 }
  0x18   :  { %860 = shalt.err (!%p857_p10)
}
  0x19   :  { %s861_s4 = scalar_lea.vmem %s27_s24, 512  ;;  %p866_p12 = scmp.lt.s32.totalorder %s27_s24, %s27_s24 }
  0x1a   :  { %p862_p11 = scmp.ne.s32.totalorder %s27_s24, %s861_s4  ;;  %p867_p13 = scmp.lt.s32.totalorder %s861_s4, %s861_s4 }
  0x1c   :  { %p868_p0 = por %p867_p13, %p866_p12 }
  0x1e   :  { %p869_p1 = pnand %p868_p0, %p862_p11 }
  0x20   :  { %872 = shalt.err (!%p869_p1)
}
  0x21   :  { %32 = dma.hbm_to_vmem [thread:$0]  %s1014_s1, 512, %s27_s24, [#allocation5], %s878_s19, %s878_s19, %s879_s20  }
  0x22   :  { %873 = dma.done.wait [#allocation3], 2688  }
  0x23   :  { %874 = vsyncadd [#allocation3], 4294964608 }
  0x24   :  { %875 = dma.done.wait [#allocation5], 512  }
  0x25   :  { %876 = vsyncadd [#allocation5], 4294966784  ;;  %v808_v0 = vld [vmem:[#allocation2 + $0x20] ss:$8 sps:$4 sm:$0xff]   ;;  %v809_v1 = vld [vmem:[#allocation2 + $0x30] ss:$8 sps:$4 sm:$0xff]  }
  0x26   :  { %662 = vmatprep.subr.bf16.mxu0 %v808_v0  ;;  %v810_v2 = vld [vmem:[#allocation2 + $0x40] ss:$8 sps:$4 sm:$0xff]   ;;  %vm96_vm0 = vcmask 457728   ;;  %v811_v4 = vld [vmem:[#allocation2 + $0x50] ss:$0 sps:$4 sm:$0xff]   ;;  %vm103_vm1 = vcmask 1043456  }
  0x27   :  { %663 = vmatpush3.bf16.msra.mxu0 %v808_v0  ;;  %v812_v3 = vld [vmem:[#allocation2] ss:$8 sps:$4 sm:$0xff]   ;;  %v105_v5 = vsel %vm103_vm1, %v811_v4, 0  ;;  %v813_v6 = vld [vmem:[#allocation2 + $0x10] ss:$8 sps:$4 sm:$0xff]   ;;  %v881_v9 = vmov 0  }
  0x28   :  { %664 = vmatprep.subr.bf16.mxu0 %v809_v1  ;;  %670 = vmatprep.mubr.msk.bf16.mxu0 %vm96_vm0, %v812_v3  ;;  %v814_v7 = vld [vmem:[#allocation2 + $0x7c] ss:$8 sps:$4 sm:$0xff]   ;;  %v816_v8 = vld [vmem:[#allocation2 + $0x78] ss:$8 sps:$4 sm:$0xff]   ;;  %v934_v14 = vld [vmem:[#allocation4] sm:$0xff]  ;;  %vm168_vm2 = vcmask 130048  }
  0x29   :  { %175 = vmatprep.subr.bf16.mxu1 %v814_v7  ;;  %207 = vmatprep.mubr.bf16.mxu1 %v881_v9  ;;  %v63_v10 = vld [vmem:[#allocation4 + $0x10] sm:$0xff]  ;;  %v64_v12 = vld [vmem:[#allocation4 + $0x18] sm:$0xff]  ;;  %v62_v15 = vld [vmem:[#allocation4 + $0x8] sm:$0xff]  ;;  %s882_s1 = smov 64   ;;  %s883_s6 = smov 96   ;;  %vm344_vm3 = vcmask 785408  }
  0x2a   :  { %176 = vmatpush1.bf16.msra.mxu1 %v816_v8  ;;  %s884_s7 = smov 32   ;;  %v819_v40 = vld [vmem:[#allocation2 + $0x5c] ss:$8 sps:$4 sm:$0xff]   ;;  %s885_s8 = smov 112   ;;  %vm414_vm4 = vcmask 261120   ;;  %vm609_vm5 = vcmask 31744  }
  0x2b   :  { %665 = vmatpush3.bf16.msra.mxu0 %v809_v1  ;;  %351 = vmatprep.subr.bf16.mxu1 %v881_v9  ;;  %s886_s9 = smov 124   ;;  %s887_s10 = smov 120  }
  0x2c   :  { %666 = vmatprep.subr.bf16.mxu0 %v810_v2  ;;  %s888_s11 = smov 116   ;;  %s889_s12 = smov 108  }
  0x2d   :  { %s890_s13 = smov 104   ;;  %s891_s14 = smov 80  }
  0x2f   :  { %667 = vmatpush3.bf16.msra.mxu0 %v810_v2 }
  0x30   :  { %682 = vmatprep.subr.msk.bf16.mxu0 %vm103_vm1, %v811_v4 }
  0x33   :  { %669 = vmatpush3.bf16.msra.mxu0 %v105_v5 }
  0x34   :  { %563 = vmatprep.subr.bf16.mxu0 %v881_v9 }
  0x36   :  { %671 = vmatmul.mubr.msk.bf16.vlgmr.msra.gmra.mrb[0].mxu0 %vm96_vm0, %v813_v6 }
  0x37   :  { %650 = vmatprep.mubr.msk.bf16.mxu0 %vm344_vm3, %v819_v40 }
 0x109   :  { %v672_v11 = vpop.f32.mrb[0].mxu0 }
 0x10a   :  { %v141_v13 = vpop.f32.mrb[1].mxu0  ;;  %v150_v17 = vadd.f32 %v672_v11, %v63_v10 }
 0x10b   :  { %v673_v16 = vpop.f32.mrb[2].mxu0  ;;  %v142_v20 = vadd.f32 %v141_v13, %v934_v14 }
 0x10c   :  { %v153_v18 = vadd.f32 %v673_v16, %v64_v12  ;;  %v144_v19 = vpop.f32.mrb[3].mxu0 }
 0x10d   :  { %v145_v21 = vadd.f32 %v144_v19, %v62_v15 }
 0x10e   :  { %v157_v22 = vpack.c.bf16 %v153_v18, %v150_v17  ;;  %v823_v18 = vld [vmem:[#allocation2 + $0x88] ss:$8 sps:$4 sm:$0xff]  }
 0x10f   :  { %v156_v23 = vpack.c.bf16 %v145_v21, %v142_v20  ;;  %v977_v20 = vld [vmem:[#allocation2 + $0x58] ss:$8 sps:$4 sm:$0xff]   ;;  %v979_v21 = vld [vmem:[#allocation2 + $0x6c] ss:$8 sps:$4 sm:$0xff]  }
 0x111   :  { %638 = vmatmul.mubr.msk.bf16.vlgmr.msra.gmra.mrb[0].mxu1 %vm168_vm2, %v156_v23  ;;  %v824_v23 = vld [vmem:[#allocation2 + $0x98] ss:$8 sps:$4 sm:$0xff]  }
 0x112   :  { %217 = vmatprep.mubr.bf16.mxu1 %v881_v9 }
 0x119   :  { %639 = vmatmul.mubr.msk.bf16.gmra.mrb[4].mxu1 %vm168_vm2, %v157_v22  ;;  %v984_v22 = vld [vmem:[#allocation2 + $0x68] ss:$8 sps:$4 sm:$0xff]  }
 0x11a   :  { %644 = vmatprep.mubr.msk.bf16.mxu1 %vm344_vm3, %v819_v40 }
 0x1e4   :  { %v209_v24 = vpop.f32.mrb[0].mxu1 }
 0x1e5   :  { %v938_v25 = vpop.f32.mrb[1].mxu1 }
 0x1e6   :  { %v213_v26 = vpop.f32.mrb[2].mxu1 }
 0x1e7   :  { %v296_v27 = vpack.c.bf16 %v213_v26, %v209_v24  ;;  %v940_v28 = vpop.f32.mrb[3].mxu1  ;;  %v708_v29 = vpack.i.bf16 %v213_v26, %v209_v24 }
 0x1e8   :  { %v738_v30 = vpack.i.bf16 %v940_v28, %v938_v25  ;;  %v304_v31 = vpack.c.bf16 %v940_v28, %v938_v25 }
 0x1e9   :  { %709 = vrot.lane.b32.xlu1 %v708_v29, %s882_s1  ;;  %699 = vrot.lane.b32.xlu0 %v708_v29, %s883_s6 }
 0x1ea   :  { %352 = vmatpush1.bf16.msra.mxu1 %v296_v27 }
 0x1eb   :  { %353 = vmatprep.subr.bf16.mxu1 %v881_v9 }
 0x1ec   :  { %v219_v32 = vpop.f32.mrb[4].mxu1 }
 0x1ed   :  { %v947_v33 = vpop.f32.mrb[5].mxu1 }
 0x1ee   :  { %v223_v34 = vpop.f32.mrb[6].mxu1 }
 0x1ef   :  { %v297_v35 = vpack.c.bf16 %v223_v34, %v219_v32  ;;  %v949_v36 = vpop.f32.mrb[7].mxu1  ;;  %v713_v37 = vpack.i.bf16 %v223_v34, %v219_v32 }
 0x1f0   :  { %v743_v38 = vpack.i.bf16 %v949_v36, %v947_v33  ;;  %v305_v39 = vpack.c.bf16 %v949_v36, %v947_v33 }
 0x1f1   :  { %714 = vrot.lane.b32.xlu1 %v713_v37, %s882_s1  ;;  %704 = vrot.lane.b32.xlu0 %v713_v37, %s883_s6 }
 0x1f2   :  { %354 = vmatpush1.bf16.msra.mxu1 %v297_v35 }
 0x1f3   :  { %355 = vmatprep.subr.bf16.mxu1 %v881_v9 }
 0x1f5   :  { %724 = vrot.lane.b32.xlu1 %v713_v37, %s884_s7  ;;  %719 = vrot.lane.b32.xlu0 %v708_v29, %s884_s7 }
 0x1f9   :  { %729 = vrot.lane.b32.xlu0 %v738_v30, %s883_s6  ;;  %734 = vrot.lane.b32.xlu1 %v743_v38, %s883_s6 }
 0x1fd   :  { %739 = vrot.lane.b32.xlu0 %v738_v30, %s882_s1  ;;  %744 = vrot.lane.b32.xlu1 %v743_v38, %s882_s1 }
 0x201   :  { %332 = vrot.lane.b32.xlu0 %v934_v14, %s885_s8  ;;  %334 = vrot.lane.b32.xlu1 %v62_v15, %s885_s8 }
 0x205   :  { %336 = vrot.lane.b32.xlu0 %v63_v10, %s885_s8  ;;  %338 = vrot.lane.b32.xlu1 %v64_v12, %s885_s8 }
 0x25b   :  { %v700_v41 = vpop.permute.xlu0 %699  ;;  %v710_v45 = vpop.permute.xlu1 %709 }
 0x25c   :  { %v702_v42 = vunpack.i.h.bf16 %v700_v41  ;;  %v701_v43 = vunpack.i.l.bf16 %v700_v41  ;;  %v712_v49 = vunpack.i.h.bf16 %v710_v45  ;;  %v711_v50 = vunpack.i.l.bf16 %v710_v45 }
 0x25e   :  { %v298_v44 = vpack.c.bf16 %v702_v42, %v701_v43  ;;  %v300_v53 = vpack.c.bf16 %v712_v49, %v711_v50 }
 0x260   :  { %356 = vmatpush1.bf16.msra.mxu1 %v298_v44 }
 0x261   :  { %357 = vmatprep.subr.bf16.mxu1 %v881_v9 }
 0x263   :  { %v705_v46 = vpop.permute.xlu0 %704  ;;  %v715_v52 = vpop.permute.xlu1 %714 }
 0x264   :  { %v707_v47 = vunpack.i.h.bf16 %v705_v46  ;;  %v706_v48 = vunpack.i.l.bf16 %v705_v46  ;;  %v717_v54 = vunpack.i.h.bf16 %v715_v52  ;;  %v716_v55 = vunpack.i.l.bf16 %v715_v52 }
 0x266   :  { %v299_v51 = vpack.c.bf16 %v707_v47, %v706_v48  ;;  %v301_v57 = vpack.c.bf16 %v717_v54, %v716_v55 }
 0x267   :  { %v720_v56 = vpop.permute.xlu0 %719  ;;  %v725_v60 = vpop.permute.xlu1 %724 }
 0x268   :  { %358 = vmatpush1.bf16.msra.mxu1 %v299_v51  ;;  %v722_v58 = vunpack.i.h.bf16 %v720_v56  ;;  %v721_v59 = vunpack.i.l.bf16 %v720_v56  ;;  %v727_v61 = vunpack.i.h.bf16 %v725_v60  ;;  %v726_v62 = vunpack.i.l.bf16 %v725_v60 }
 0x269   :  { %359 = vmatprep.subr.bf16.mxu1 %v881_v9 }
 0x26a   :  { %v302_v63 = vpack.c.bf16 %v722_v58, %v721_v59  ;;  %v303_v0 = vpack.c.bf16 %v727_v61, %v726_v62 }
 0x26b   :  { %v730_v1 = vpop.permute.xlu0 %729  ;;  %v735_v4 = vpop.permute.xlu1 %734 }
 0x26c   :  { %360 = vmatpush1.bf16.msra.mxu1 %v300_v53  ;;  %v732_v2 = vunpack.i.h.bf16 %v730_v1  ;;  %v731_v3 = vunpack.i.l.bf16 %v730_v1  ;;  %v737_v6 = vunpack.i.h.bf16 %v735_v4  ;;  %v736_v7 = vunpack.i.l.bf16 %v735_v4 }
 0x26d   :  { %361 = vmatprep.subr.bf16.mxu1 %v881_v9 }
 0x26e   :  { %v306_v5 = vpack.c.bf16 %v732_v2, %v731_v3  ;;  %v307_v10 = vpack.c.bf16 %v737_v6, %v736_v7 }
 0x26f   :  { %v740_v8 = vpop.permute.xlu0 %739  ;;  %v745_v13 = vpop.permute.xlu1 %744 }
 0x270   :  { %362 = vmatpush1.bf16.msra.mxu1 %v301_v57  ;;  %v742_v11 = vunpack.i.h.bf16 %v740_v8  ;;  %v741_v12 = vunpack.i.l.bf16 %v740_v8  ;;  %v747_v16 = vunpack.i.h.bf16 %v745_v13  ;;  %v746_v17 = vunpack.i.l.bf16 %v745_v13 }
 0x271   :  { %363 = vmatprep.subr.bf16.mxu1 %v881_v9 }
 0x272   :  { %v308_v15 = vpack.c.bf16 %v742_v11, %v741_v12  ;;  %v309_v19 = vpack.c.bf16 %v747_v16, %v746_v17 }
 0x273   :  { %v333_v24 = vpop.permute.xlu0 %332  ;;  %v335_v26 = vpop.permute.xlu1 %334 }
 0x274   :  { %364 = vmatpush1.bf16.msra.mxu1 %v302_v63 }
 0x275   :  { %365 = vmatprep.subr.bf16.mxu1 %v881_v9 }
 0x277   :  { %v337_v33 = vpop.permute.xlu0 %336  ;;  %v339_v35 = vpop.permute.xlu1 %338 }
 0x278   :  { %366 = vmatpush1.bf16.msra.mxu1 %v303_v0 }
 0x279   :  { %367 = vmatprep.subr.bf16.mxu1 %v881_v9 }
 0x27c   :  { %368 = vmatpush1.bf16.msra.mxu1 %v304_v31 }
 0x27d   :  { %369 = vmatprep.subr.bf16.mxu1 %v881_v9 }
 0x280   :  { %370 = vmatpush1.bf16.msra.mxu1 %v305_v39 }
 0x281   :  { %371 = vmatprep.subr.bf16.mxu1 %v881_v9 }
 0x284   :  { %372 = vmatpush1.bf16.msra.mxu1 %v306_v5 }
 0x285   :  { %373 = vmatprep.subr.bf16.mxu1 %v881_v9 }
 0x288   :  { %374 = vmatpush1.bf16.msra.mxu1 %v307_v10 }
 0x289   :  { %375 = vmatprep.subr.bf16.mxu1 %v881_v9 }
 0x28c   :  { %376 = vmatpush1.bf16.msra.mxu1 %v308_v15 }
 0x28d   :  { %377 = vmatprep.subr.bf16.mxu1 %v881_v9 }
 0x290   :  { %378 = vmatpush1.bf16.msra.mxu1 %v309_v19 }
 0x291   :  { %674 = vmatprep.subr.bf16.mxu1 %v823_v18 }
 0x293   :  { %384 = vmatmul.mubr.bf16.vlgmr.msra.gmra.mrb[8].mxu1 %v977_v20 }
 0x294   :  { %645 = vmatprep.mubr.msk.bf16.mxu1 %vm344_vm3, %v979_v21  ;;  %675 = vmatpush3.bf16.msra.mxu1 %v823_v18 }
 0x295   :  { %676 = vmatprep.subr.bf16.mxu1 %v824_v23 }
 0x298   :  { %677 = vmatpush3.bf16.msra.mxu1 %v824_v23 }
 0x29b   :  { %392 = vmatmul.mubr.bf16.gmra.mrb[12].mxu1 %v984_v22 }
 0x366   :  { %v385_v25 = vpop.f32.mrb[8].mxu1 }
 0x367   :  { %v387_v27 = vpop.f32.mrb[9].mxu1  ;;  %v386_v29 = vadd.f32 %v385_v25, %v333_v24 }
 0x368   :  { %v388_v28 = vpop.f32.mrb[10].mxu1 }
 0x369   :  { %v389_v30 = vadd.f32 %v388_v28, %v335_v26  ;;  %v390_v31 = vpop.f32.mrb[11].mxu1 }
 0x36b   :  { %v400_v32 = vpack.c.bf16 %v389_v30, %v386_v29 }
 0x36d   :  { %678 = vmatprep.mubr.msk.bf16.mxu1 %vm414_vm4, %v400_v32 }
 0x36e   :  { %v393_v34 = vpop.f32.mrb[12].mxu1 }
 0x36f   :  { %v395_v36 = vpop.f32.mrb[13].mxu1  ;;  %v394_v38 = vadd.f32 %v393_v34, %v337_v33 }
 0x370   :  { %v396_v37 = vpop.f32.mrb[14].mxu1 }
 0x371   :  { %v397_v39 = vadd.f32 %v396_v37, %v339_v35  ;;  %v398_v40 = vpop.f32.mrb[15].mxu1 }
 0x373   :  { %v401_v41 = vpack.c.bf16 %v397_v39, %v394_v38 }
 0x375   :  { %679 = vmatmul.mubr.msk.bf16.vlgmr.msra.gmra.mrb[16].mxu1 %vm414_vm4, %v401_v41 }
 0x448   :  { %v680_v42 = vpop.f32.mrb[16].mxu1 }
 0x449   :  { %v455_v43 = vpop.f32.mrb[17].mxu1 }
 0x44a   :  { %v681_v44 = vpop.f32.mrb[18].mxu1 }
 0x44b   :  { %v458_v45 = vpop.f32.mrb[19].mxu1  ;;  %v753_v46 = vpack.i.bf16 %v681_v44, %v680_v42  ;;  %v547_v47 = vpack.c.bf16 %v681_v44, %v680_v42 }
 0x44c   :  { %v748_v48 = vpack.i.bf16 %v458_v45, %v455_v43  ;;  %v546_v49 = vpack.c.bf16 %v458_v45, %v455_v43 }
 0x44d   :  { %754 = vrot.lane.b32.xlu1 %v753_v46, %s886_s9 }
 0x44e   :  { %749 = vrot.lane.b32.xlu0 %v748_v48, %s886_s9  ;;  %564 = vmatpush1.bf16.msra.mxu0 %v546_v49 }
 0x44f   :  { %565 = vmatprep.subr.bf16.mxu0 %v881_v9 }
 0x451   :  { %764 = vrot.lane.b32.xlu1 %v753_v46, %s887_s10 }
 0x452   :  { %759 = vrot.lane.b32.xlu0 %v748_v48, %s887_s10  ;;  %566 = vmatpush1.bf16.msra.mxu0 %v547_v47 }
 0x453   :  { %567 = vmatprep.subr.bf16.mxu0 %v881_v9 }
 0x455   :  { %774 = vrot.lane.b32.xlu1 %v753_v46, %s888_s11 }
 0x456   :  { %769 = vrot.lane.b32.xlu0 %v748_v48, %s888_s11 }
 0x459   :  { %784 = vrot.lane.b32.xlu1 %v753_v46, %s885_s8 }
 0x45a   :  { %779 = vrot.lane.b32.xlu0 %v748_v48, %s885_s8 }
 0x45d   :  { %794 = vrot.lane.b32.xlu1 %v753_v46, %s889_s12 }
 0x45e   :  { %789 = vrot.lane.b32.xlu0 %v748_v48, %s889_s12 }
 0x461   :  { %804 = vrot.lane.b32.xlu1 %v753_v46, %s890_s13 }
 0x462   :  { %799 = vrot.lane.b32.xlu0 %v748_v48, %s890_s13 }
 0x466   :  { %560 = vrot.lane.b32.xlu0 %v934_v14, %s891_s14 }
 0x4bf   :  { %v755_v50 = vpop.permute.xlu1 %754 }
 0x4c0   :  { %v750_v51 = vpop.permute.xlu0 %749  ;;  %v757_v54 = vunpack.i.h.bf16 %v755_v50  ;;  %v756_v55 = vunpack.i.l.bf16 %v755_v50 }
 0x4c1   :  { %v752_v52 = vunpack.i.h.bf16 %v750_v51  ;;  %v751_v53 = vunpack.i.l.bf16 %v750_v51 }
 0x4c2   :  { %v549_v58 = vpack.c.bf16 %v757_v54, %v756_v55 }
 0x4c3   :  { %v548_v56 = vpack.c.bf16 %v752_v52, %v751_v53  ;;  %v765_v61 = vpop.permute.xlu1 %764 }
 0x4c4   :  { %v760_v57 = vpop.permute.xlu0 %759  ;;  %v767_v62 = vunpack.i.h.bf16 %v765_v61  ;;  %v766_v14 = vunpack.i.l.bf16 %v765_v61 }
 0x4c5   :  { %568 = vmatpush1.bf16.msra.mxu0 %v548_v56  ;;  %v762_v59 = vunpack.i.h.bf16 %v760_v57  ;;  %v761_v60 = vunpack.i.l.bf16 %v760_v57 }
 0x4c6   :  { %569 = vmatprep.subr.bf16.mxu0 %v881_v9  ;;  %v551_v1 = vpack.c.bf16 %v767_v62, %v766_v14 }
 0x4c7   :  { %v550_v63 = vpack.c.bf16 %v762_v59, %v761_v60  ;;  %v775_v4 = vpop.permute.xlu1 %774 }
 0x4c8   :  { %v770_v0 = vpop.permute.xlu0 %769  ;;  %v777_v5 = vunpack.i.h.bf16 %v775_v4  ;;  %v776_v6 = vunpack.i.l.bf16 %v775_v4 }
 0x4c9   :  { %570 = vmatpush1.bf16.msra.mxu0 %v549_v58  ;;  %v772_v2 = vunpack.i.h.bf16 %v770_v0  ;;  %v771_v3 = vunpack.i.l.bf16 %v770_v0 }
 0x4ca   :  { %571 = vmatprep.subr.bf16.mxu0 %v881_v9  ;;  %v553_v10 = vpack.c.bf16 %v777_v5, %v776_v6 }
 0x4cb   :  { %v552_v7 = vpack.c.bf16 %v772_v2, %v771_v3  ;;  %v785_v13 = vpop.permute.xlu1 %784 }
 0x4cc   :  { %v780_v8 = vpop.permute.xlu0 %779  ;;  %v787_v15 = vunpack.i.h.bf16 %v785_v13  ;;  %v786_v16 = vunpack.i.l.bf16 %v785_v13 }
 0x4cd   :  { %572 = vmatpush1.bf16.msra.mxu0 %v550_v63  ;;  %v782_v11 = vunpack.i.h.bf16 %v780_v8  ;;  %v781_v12 = vunpack.i.l.bf16 %v780_v8 }
 0x4ce   :  { %573 = vmatprep.subr.bf16.mxu0 %v881_v9  ;;  %v555_v19 = vpack.c.bf16 %v787_v15, %v786_v16 }
 0x4cf   :  { %v554_v17 = vpack.c.bf16 %v782_v11, %v781_v12  ;;  %v795_v25 = vpop.permute.xlu1 %794 }
 0x4d0   :  { %v790_v18 = vpop.permute.xlu0 %789  ;;  %v797_v26 = vunpack.i.h.bf16 %v795_v25  ;;  %v796_v27 = vunpack.i.l.bf16 %v795_v25 }
 0x4d1   :  { %574 = vmatpush1.bf16.msra.mxu0 %v551_v1  ;;  %v792_v23 = vunpack.i.h.bf16 %v790_v18  ;;  %v791_v24 = vunpack.i.l.bf16 %v790_v18 }
 0x4d2   :  { %575 = vmatprep.subr.bf16.mxu0 %v881_v9  ;;  %v557_v30 = vpack.c.bf16 %v797_v26, %v796_v27 }
 0x4d3   :  { %v556_v28 = vpack.c.bf16 %v792_v23, %v791_v24  ;;  %v805_v33 = vpop.permute.xlu1 %804 }
 0x4d4   :  { %v800_v29 = vpop.permute.xlu0 %799  ;;  %v807_v34 = vunpack.i.h.bf16 %v805_v33  ;;  %v806_v35 = vunpack.i.l.bf16 %v805_v33 }
 0x4d5   :  { %576 = vmatpush1.bf16.msra.mxu0 %v552_v7  ;;  %v802_v31 = vunpack.i.h.bf16 %v800_v29  ;;  %v801_v32 = vunpack.i.l.bf16 %v800_v29 }
 0x4d6   :  { %577 = vmatprep.subr.bf16.mxu0 %v881_v9  ;;  %v559_v37 = vpack.c.bf16 %v807_v34, %v806_v35 }
 0x4d7   :  { %v558_v36 = vpack.c.bf16 %v802_v31, %v801_v32 }
 0x4d8   :  { %v561_v38 = vpop.permute.xlu0 %560 }
 0x4d9   :  { %578 = vmatpush1.bf16.msra.mxu0 %v553_v10 }
 0x4da   :  { %579 = vmatprep.subr.bf16.mxu0 %v881_v9 }
 0x4dd   :  { %580 = vmatpush1.bf16.msra.mxu0 %v554_v17 }
 0x4de   :  { %581 = vmatprep.subr.bf16.mxu0 %v881_v9 }
 0x4e1   :  { %582 = vmatpush1.bf16.msra.mxu0 %v555_v19 }
 0x4e2   :  { %583 = vmatprep.subr.bf16.mxu0 %v881_v9 }
 0x4e5   :  { %584 = vmatpush1.bf16.msra.mxu0 %v556_v28 }
 0x4e6   :  { %585 = vmatprep.subr.bf16.mxu0 %v881_v9 }
 0x4e9   :  { %586 = vmatpush1.bf16.msra.mxu0 %v557_v30 }
 0x4ea   :  { %587 = vmatprep.subr.bf16.mxu0 %v881_v9 }
 0x4ed   :  { %588 = vmatpush1.bf16.msra.mxu0 %v558_v36 }
 0x4ee   :  { %589 = vmatprep.subr.bf16.mxu0 %v881_v9 }
 0x4f1   :  { %590 = vmatpush1.bf16.msra.mxu0 %v559_v37 }
 0x4f4   :  { %596 = vmatmul.mubr.bf16.vlgmr.msra.gmra.mrb[4].mxu0 %v977_v20 }
 0x4f5   :  { %651 = vmatprep.mubr.msk.bf16.mxu0 %vm344_vm3, %v979_v21 }
 0x4fc   :  { %603 = vmatmul.mubr.bf16.gmra.mrb[8].mxu0 %v984_v22 }
 0x5c7   :  { %v597_v39 = vpop.f32.mrb[4].mxu0 }
 0x5c8   :  { %v598_v40 = vadd.f32 %v597_v39, %v561_v38  ;;  %v599_v41 = vpop.f32.mrb[5].mxu0 }
 0x5c9   :  { %v600_v42 = vpop.f32.mrb[6].mxu0 }
 0x5ca   :  { %v601_v43 = vpop.f32.mrb[7].mxu0  ;;  %v610_v44 = vsel %vm609_vm5, %v598_v40, -inf }
 0x5cb   :  { %611 = vmax.xlane.f32.xlu1 %v610_v44 }
 0x5cf   :  { %v604_v9 = vpop.f32.mrb[8].mxu0 }
 0x5d0   :  { %v605_v45 = vpop.f32.mrb[9].mxu0 }
 0x5d1   :  { %v606_v46 = vpop.f32.mrb[10].mxu0 }
 0x5d2   :  { %v607_v47 = vpop.f32.mrb[11].mxu0 }
 0x658   :  { %v612_v20 = vpop.xlane.xlu1 %611 }
 0x659   :  { %v613_v48 = vsub.f32 %v598_v40, %v612_v20 }
 0x65b   :  { %v614_v49 = vmul.f32 1.442695, %v613_v48 }
 0x65d   :  { %825 = vpow2.f32 %v614_v49 }
 0x667   :  { %v826_v21 = vpop.eup %825 }
 0x668   :  { %v616_v22 = vsel %vm609_vm5, %v826_v21, 0.0 }
 0x669   :  { %617 = vadd.xlane.f32.xlu0 %v616_v22 }
 0x6f6   :  { %v618_v50 = vpop.xlane.xlu0 %617 }
 0x6f7   :  { %827 = vrcp.f32 %v618_v50 }
 0x701   :  { %v828_v51 = vpop.eup %827 }
 0x702   :  { %v620_v52 = vmul.f32 %v828_v51, %v826_v21 }
 0x704   :  { %621 = vst.msk [vmem:[%s1015_s2] sm:$0xff] %vm609_vm5, %v620_v52 }
 0x705   :  { %626 = vsyncpa [#allocation3], 1 }
 0x706   :  { %627 = vsyncpa [#allocation5], 1 }

</bundles_post_ra>
